<compile_context>
chip_gen: v6e
topology: v6e:2x2x1
jax: 0.10.0
libtpu: 0.0.40
codegen_flags: <defaults>
</compile_context>

<pallas_src>
import numpy as np
import jax
import jax.numpy as jnp
from jax import lax
from jax.experimental import pallas as pl
from jax.experimental.pallas import tpu as pltpu


def _round_up(x, m):
    return -(-x // m) * m


# ----------------------------------------------------------------------------
# Pallas kernel 1: fused Grad-CAM attention maps (gt + confounder in one pass)
#   weights_k = adaptive_avg_pool2d(relu(backward_feature_k), 1)   k in {gt, conf}
#   A_k       = relu( (forward_feature * weights_k).sum(dim=1) )
# C-tiled grid: (batch tiles [parallel], channel tiles [arbitrary/reduction]).
# ----------------------------------------------------------------------------
def _make_cam_pair_kernel(inv_hw):
    inv_hw = float(inv_hw)

    def kernel(fwd_ref, bgt_ref, bcf_ref, at_ref, ac_ref, acc_t, acc_c):
        c_idx = pl.program_id(1)

        @pl.when(c_idx == 0)
        def _():
            acc_t[...] = jnp.zeros_like(acc_t)
            acc_c[...] = jnp.zeros_like(acc_c)

        # (block_b, block_c, HWp) bf16, fed straight to the MXU (no f32 up-convert).
        fwd = fwd_ref[...]

        # Grad-CAM channel weights: relu + spatial sum in f32 (v5e has no bf16
        # VALU), divided by the TRUE spatial size (pad lanes are zero).
        w_gt = jnp.sum(jnp.maximum(bgt_ref[...].astype(jnp.float32), 0.0), axis=2) * inv_hw
        w_cf = jnp.sum(jnp.maximum(bcf_ref[...].astype(jnp.float32), 0.0), axis=2) * inv_hw
        w = jnp.stack([w_gt, w_cf], axis=1).astype(jnp.bfloat16)      # (block_b, 2, block_c)

        # Channel reduction on the MXU, f32 accumulate (same batched-dot form
        # as the flash-attention reference kernel).
        cams = jnp.einsum("bkc,bcs->bks", w, fwd,
                          preferred_element_type=jnp.float32)          # (block_b, 2, HWp)
        acc_t[...] += cams[:, 0, :]
        acc_c[...] += cams[:, 1, :]

        @pl.when(c_idx == pl.num_programs(1) - 1)
        def _():
            # Final relu; stores are lane/sublane-dense (block_b, HWp) f32 slabs.
            at_ref[...] = jnp.maximum(acc_t[...], 0.0)
            ac_ref[...] = jnp.maximum(acc_c[...], 0.0)

    return kernel


def cam_pair_pallas(fwd_nchw, bwd_gt_nchw, bwd_conf_nchw, *,
                    block_b=None, block_c=None,
                    vmem_limit_bytes=48 * 1024 * 1024):
    """Returns (A_t, A_conf), each (B, HWp) float32, lane-dense.

    HWp = H*W rounded up to a multiple of 128; padded columns are exactly 0.
    NOTE: tile sizes / vmem limit must be re-derived per generation at the real
    feature shapes (v7x: 64 MiB physical VMEM; v5e/v6e: 128 MiB, raise limit).
    """
    B, C, H, W = fwd_nchw.shape
    HW = H * W
    HWp = _round_up(HW, 128)

    if block_b is None:
        block_b = 8 if B % 8 == 0 else B          # (8,128)-safe: mult of 8 or full B
    assert B % block_b == 0, "block_b must divide the batch"

    if block_c is None:
        block_c = C if C <= 256 else 256          # C-tiling keeps tiles shape-independent of C
    block_c = _round_up(min(block_c, _round_up(C, 16)), 16)   # bf16 sublane packing
    Cp = _round_up(C, block_c)

    # bf16 across the HBM boundary; kernel keeps fwd in bf16 for the MXU.
    def prep(a):
        a = a.reshape(B, C, HW).astype(jnp.bfloat16)
        if Cp != C or HWp != HW:
            a = jnp.pad(a, ((0, 0), (0, Cp - C), (0, HWp - HW)))
        return a

    fwd, bgt, bcf = prep(fwd_nchw), prep(bwd_gt_nchw), prep(bwd_conf_nchw)

    grid = (B // block_b, Cp // block_c)
    in_spec = pl.BlockSpec((block_b, block_c, HWp), lambda b, c: (b, c, 0))
    out_spec = pl.BlockSpec((block_b, HWp), lambda b, c: (b, 0))   # resident across c

    at, ac = pl.pallas_call(
        _make_cam_pair_kernel(1.0 / HW),
        out_shape=(jax.ShapeDtypeStruct((B, HWp), jnp.float32),
                   jax.ShapeDtypeStruct((B, HWp), jnp.float32)),
        grid=grid,
        in_specs=[in_spec, in_spec, in_spec],
        out_specs=(out_spec, out_spec),
        scratch_shapes=[pltpu.VMEM((block_b, HWp), jnp.float32),
                        pltpu.VMEM((block_b, HWp), jnp.float32)],
        compiler_params=pltpu.CompilerParams(
            dimension_semantics=("parallel", "arbitrary"),
            vmem_limit_bytes=vmem_limit_bytes),
    )(fwd, bgt, bcf)
    return at, ac


# ----------------------------------------------------------------------------
# Pallas kernel 2: attention separation / consistency losses
#   L_as(At, Ac): L2-normalize over spatial dims, sigma = 0.55*max(At_n),
#                 mask = sigmoid(100*(At_n - sigma + 1e-8)),
#                 L = 2*sum(min(At_n, Ac_n)*mask) / (sum(At_n + Ac_n) + 1e-8)
#   L_ac(At, mask) = 0.8 - sum(At*mask)/sum(At)
#   (as in the PyTorch source, L_as_in pairs A_t_la with A_conf_in, so the
#    mask/sigma of L_as_la and L_as_in are identical -> computed once.)
#   Zero lane-padding of the CAM maps leaves all sums / the global max intact.
# ----------------------------------------------------------------------------
def _losses_kernel(at_la_ref, ac_la_ref, at_in_ref, ac_in_ref, out_ref):
    at_la = at_la_ref[...]                 # (B, HWp) f32, lane-dense
    ac_la = ac_la_ref[...]
    at_in = at_in_ref[...]
    ac_in = ac_in_ref[...]

    def l2norm(x):  # F.normalize(p=2, dim=spatial): x / max(||x||, 1e-12)
        ss = jnp.sum(x * x, axis=-1, keepdims=True)           # (B, 1)
        return x * lax.rsqrt(jnp.maximum(ss, 1e-24))           # rsqrt -> EUP slot

    s_at = l2norm(at_la)
    s_ac_la = l2norm(ac_la)
    s_ac_in = l2norm(ac_in)

    # sigma is a global (whole-batch) max, matching the PyTorch reference.
    sigma = 0.55 * jnp.max(s_at)
    mask = jax.nn.sigmoid(100.0 * (s_at - sigma + 1e-8))       # shared by _la and _in

    num_la = jnp.sum(jnp.minimum(s_at, s_ac_la) * mask)
    den_la = jnp.sum(s_at + s_ac_la)
    num_in = jnp.sum(jnp.minimum(s_at, s_ac_in) * mask)
    den_in = jnp.sum(s_at + s_ac_in)

    out_ref[0] = 2.0 * num_la / (den_la + 1e-8)
    out_ref[1] = 2.0 * num_in / (den_in + 1e-8)
    # 1e-12 only guards the degenerate all-zero-CAM case (original divides unguarded).
    out_ref[2] = 0.8 - jnp.sum(at_in * mask) / (jnp.sum(at_in) + 1e-12)


def attention_losses_pallas(A_t_la, A_conf_la, A_t_in, A_conf_in):
    """Inputs: (B, HWp) float32 maps straight from the CAM kernel (padding ok)."""
    assert A_t_la.shape == A_conf_la.shape == A_t_in.shape == A_conf_in.shape
    vmem = pl.BlockSpec(memory_space=pltpu.MemorySpace.VMEM)
    smem = pl.BlockSpec(memory_space=pltpu.MemorySpace.SMEM)
    losses = pl.pallas_call(
        _losses_kernel,
        out_shape=jax.ShapeDtypeStruct((3,), jnp.float32),
        in_specs=[vmem, vmem, vmem, vmem],
        out_specs=smem,
    )(A_t_la.astype(jnp.float32), A_conf_la.astype(jnp.float32),
      A_t_in.astype(jnp.float32), A_conf_in.astype(jnp.float32))
    return losses[0], losses[1], losses[2]


# ----------------------------------------------------------------------------
# Synthetic backbone (glue): conv "in" layer -> conv "la" layer -> GAP -> FC
# ----------------------------------------------------------------------------
def _conv(x, w, b, stride):
    y = lax.conv_general_dilated(
        x, w, (stride, stride), "SAME",
        dimension_numbers=("NCHW", "OIHW", "NCHW"))
    return y + b[None, :, None, None]


def stage1(x, p):    # grad_layers[0] ("in")
    return jax.nn.relu(_conv(x, p["w1"], p["b1"], 2))


def stage2(f1, p):   # grad_layers[1] ("la")
    return jax.nn.relu(_conv(f1, p["w2"], p["b2"], 1))


def stage3(f2, p):   # GAP + classifier head
    pooled = jnp.mean(f2, axis=(2, 3))
    return pooled @ p["wfc"] + p["bfc"]


def init_params(key, cin=3, c1=16, c2=32, num_classes=8):
    ks = jax.random.split(key, 5)
    return {
        "w1": 0.1 * jax.random.normal(ks[0], (c1, cin, 3, 3), jnp.float32),
        "b1": jnp.zeros((c1,), jnp.float32),
        "w2": 0.1 * jax.random.normal(ks[1], (c2, c1, 3, 3), jnp.float32),
        "b2": jnp.zeros((c2,), jnp.float32),
        "wfc": 0.1 * jax.random.normal(ks[2], (c2, num_classes), jnp.float32),
        "bfc": jnp.zeros((num_classes,), jnp.float32),
    }


# ----------------------------------------------------------------------------
# SFOCUS forward (dataset='ImageNet', plus=False)
# ----------------------------------------------------------------------------
def sfocus_forward(params, images, labels, num_classes):
    f1 = stage1(images, params)      # (B, C1, h1, w1)  "in" layer features
    f2 = stage2(f1, params)          # (B, C2, h2, w2)  "la" layer features
    logits = stage3(f2, params)      # (B, num_classes)

    # confounder class = second-best where the top-1 equals the label
    _, idx = lax.top_k(logits, 2)
    preds, seconds = idx[:, 0], idx[:, 1]
    preds = jnp.where(preds == labels, seconds, preds)
    conf_ohe = jax.nn.one_hot(preds, num_classes, dtype=jnp.float32)
    gt_ohe = jax.nn.one_hot(labels, num_classes, dtype=jnp.float32)

    def feature_grads(ohe):
        # populate_grads: s = (logits*ohe).sum(); backward(gradient=s) -> grads scaled by s
        s_val = jnp.sum(logits * ohe)
        g1 = jax.grad(lambda f: jnp.sum(stage3(stage2(f, params), params) * ohe))(f1)
        g2 = jax.grad(lambda f: jnp.sum(stage3(f, params) * ohe))(f2)
        return s_val * g1, s_val * g2

    g1_c, g2_c = feature_grads(conf_ohe)
    g1_t, g2_t = feature_grads(gt_ohe)

    # One fused pallas_call per feature level (feature DMA'd once, both maps out).
    A_t_in, A_conf_in = cam_pair_pallas(f1, g1_t, g1_c)   # (B, HW1p) each (lane-padded)
    A_t_la, A_conf_la = cam_pair_pallas(f2, g2_t, g2_c)   # (B, HW2p) each

    # Loss kernel works directly on the padded maps (padding is provably inert).
    L_as_la, L_as_in, L_ac_in = attention_losses_pallas(
        A_t_la, A_conf_la, A_t_in, A_conf_in)

    B = f2.shape[0]
    H2, W2 = f2.shape[2], f2.shape[3]
    HW2 = H2 * W2
    A_t_la_map = A_t_la[:, :HW2].reshape(B, 1, H2, W2)
    A_conf_la_map = A_conf_la[:, :HW2].reshape(B, 1, H2, W2)
    return logits, L_as_la, L_as_in, L_ac_in, A_t_la_map, A_conf_la_map


# ----------------------------------------------------------------------------
# Pure-JAX references (for correctness checks of the Pallas hot paths).
# The reference applies the same bf16 quantization (inputs and Grad-CAM
# weights) as the kernel's HBM-boundary / MXU-operand dtypes — documented
# numerical deviation from the f32 PyTorch source.
# ----------------------------------------------------------------------------
def cam_ref(fwd, bwd):
    q16 = lambda a: a.astype(jnp.bfloat16).astype(jnp.float32)
    w = jnp.mean(jax.nn.relu(q16(bwd)), axis=(2, 3), keepdims=True)
    w = q16(w)
    return jax.nn.relu(jnp.sum(q16(fwd) * w, axis=1, keepdims=True))


def losses_ref(A_t_la, A_conf_la, A_t_in, A_conf_in):
    def l2n(x):
        n = jnp.sqrt(jnp.sum(x * x, axis=(2, 3), keepdims=True))
        return x / jnp.maximum(n, 1e-12)
    s_at, s_acla, s_acin = l2n(A_t_la), l2n(A_conf_la), l2n(A_conf_in)
    sig = 0.55 * jnp.max(s_at)
    m = jax.nn.sigmoid(100.0 * (s_at - sig + 1e-8))
    las_la = 2.0 * jnp.sum(jnp.minimum(s_at, s_acla) * m) / (jnp.sum(s_at + s_acla) + 1e-8)
    las_in = 2.0 * jnp.sum(jnp.minimum(s_at, s_acin) * m) / (jnp.sum(s_at + s_acin) + 1e-8)
    lac_in = 0.8 - jnp.sum(A_t_in * m) / jnp.sum(A_t_in)
    return las_la, las_in, lac_in


if __name__ == "__main__":
    key = jax.random.PRNGKey(0)
    k_img, k_par = jax.random.split(key)

    B, CIN, H, W = 2, 3, 16, 16
    NUM_CLASSES = 8
    images = jax.random.normal(k_img, (B, CIN, H, W), jnp.float32)
    labels = jnp.array([1, 3], dtype=jnp.int32)
    params = init_params(k_par, cin=CIN, c1=16, c2=32, num_classes=NUM_CLASSES)

    outs = jax.block_until_ready(sfocus_forward(params, images, labels, NUM_CLASSES))
    logits, L_as_la, L_as_in, L_ac_in, A_t_la, A_conf_la = outs

    # ---- correctness check of the Pallas kernels against pure-JAX references ----
    f1 = stage1(images, params)
    f2 = stage2(f1, params)
    lg = stage3(f2, params)
    _, idx = lax.top_k(lg, 2)
    preds = jnp.where(idx[:, 0] == labels, idx[:, 1], idx[:, 0])
    conf_ohe = jax.nn.one_hot(preds, NUM_CLASSES, dtype=jnp.float32)
    gt_ohe = jax.nn.one_hot(labels, NUM_CLASSES, dtype=jnp.float32)

    def fg(ohe):
        s = jnp.sum(lg * ohe)
        g1 = jax.grad(lambda f: jnp.sum(stage3(stage2(f, params), params) * ohe))(f1)
        g2 = jax.grad(lambda f: jnp.sum(stage3(f, params) * ohe))(f2)
        return s * g1, s * g2

    g1c, g2c = fg(conf_ohe)
    g1t, g2t = fg(gt_ohe)

    A_t_la_r = cam_ref(f2, g2t)
    A_conf_la_r = cam_ref(f2, g2c)
    A_t_in_r = cam_ref(f1, g1t)
    A_conf_in_r = cam_ref(f1, g1c)

    np.testing.assert_allclose(np.asarray(A_t_la), np.asarray(A_t_la_r), rtol=1e-2, atol=1e-4)
    np.testing.assert_allclose(np.asarray(A_conf_la), np.asarray(A_conf_la_r), rtol=1e-2, atol=1e-4)

    at_in_p, ac_in_p = cam_pair_pallas(f1, g1t, g1c)     # (B, HW1p) padded
    h1, w1 = f1.shape[2], f1.shape[3]
    hw1 = h1 * w1
    A_t_in_p = at_in_p[:, :hw1].reshape(B, 1, h1, w1)
    A_conf_in_p = ac_in_p[:, :hw1].reshape(B, 1, h1, w1)
    np.testing.assert_allclose(np.asarray(A_t_in_p), np.asarray(A_t_in_r), rtol=1e-2, atol=1e-4)
    np.testing.assert_allclose(np.asarray(A_conf_in_p), np.asarray(A_conf_in_r), rtol=1e-2, atol=1e-4)
    # Padded lane columns of the CAM kernel output must be exactly zero.
    np.testing.assert_array_equal(np.asarray(at_in_p[:, hw1:]), 0.0)

    # Loss kernel checked in isolation against the reference applied to the
    # same (Pallas-produced, unpadded) attention maps.
    las_la_r, las_in_r, lac_in_r = losses_ref(A_t_la, A_conf_la, A_t_in_p, A_conf_in_p)
    np.testing.assert_allclose(float(L_as_la), float(las_la_r), rtol=5e-3, atol=1e-4)
    np.testing.assert_allclose(float(L_as_in), float(las_in_r), rtol=5e-3, atol=1e-4)
    np.testing.assert_allclose(float(L_ac_in), float(lac_in_r), rtol=5e-3, atol=1e-4)

    # TODO(synk): get_cam (bilinear resize + cv2 colormap) and get_hscore are not on
    # the plus=False forward path and are not translated.
    print("KERNEL_OK")
</pallas_src>

<mosaic_0001>
module attributes {stable_mosaic.version = 11 : i64} {
  func.func @kernel(%arg0: i32, %arg1: i32, %arg2: memref<2x16x128xbf16, #tpu.memory_space<vmem>>, %arg3: memref<2x16x128xbf16, #tpu.memory_space<vmem>>, %arg4: memref<2x16x128xbf16, #tpu.memory_space<vmem>>, %arg5: memref<2x128xf32, #tpu.memory_space<vmem>>, %arg6: memref<2x128xf32, #tpu.memory_space<vmem>>, %arg7: memref<2x128xf32, #tpu.memory_space<vmem>>, %arg8: memref<2x128xf32, #tpu.memory_space<vmem>>) attributes {dimension_semantics = [#tpu.dimension_semantics<parallel>, #tpu.dimension_semantics<arbitrary>], iteration_bounds = array<i64: 1, 1>, scalar_prefetch = 0 : i64, scratch_operands = 2 : i64, tpu.core_type = #tpu.core_type<tc>, window_params = [{transform_indices = @transform_0, window_bounds = array<i64: 2, 16, 128>}, {transform_indices = @transform_1, window_bounds = array<i64: 2, 16, 128>}, {transform_indices = @transform_2, window_bounds = array<i64: 2, 16, 128>}, {transform_indices = @transform_3, window_bounds = array<i64: 2, 128>}, {transform_indices = @transform_4, window_bounds = array<i64: 2, 128>}]} {
    %c0_i32 = arith.constant 0 : i32
    %0 = arith.cmpi eq, %arg1, %c0_i32 : i32
    %1 = arith.extui %0 : i1 to i32
    %c0_i32_0 = arith.constant 0 : i32
    %2 = arith.cmpi ne, %1, %c0_i32_0 : i32
    scf.if %2 {
      %cst_25 = arith.constant 0.000000e+00 : f32
      %36 = vector.broadcast %cst_25 : f32 to vector<2x128xf32>
      %c0_26 = arith.constant 0 : index
      %c0_27 = arith.constant 0 : index
      %37 = vector.load %arg7[%c0_26, %c0_27] : memref<2x128xf32, #tpu.memory_space<vmem>>, vector<2x128xf32>
      tpu.vector_store %arg7[%c0_26, %c0_27], %36 {strides = array<i32>} : memref<2x128xf32, #tpu.memory_space<vmem>>, vector<2x128xf32>,
      %cst_28 = arith.constant 0.000000e+00 : f32
      %38 = vector.broadcast %cst_28 : f32 to vector<2x128xf32>
      %c0_29 = arith.constant 0 : index
      %c0_30 = arith.constant 0 : index
      %39 = vector.load %arg8[%c0_29, %c0_30] : memref<2x128xf32, #tpu.memory_space<vmem>>, vector<2x128xf32>
      tpu.vector_store %arg8[%c0_29, %c0_30], %38 {strides = array<i32>} : memref<2x128xf32, #tpu.memory_space<vmem>>, vector<2x128xf32>,
    } else {
    }
    %c0 = arith.constant 0 : index
    %c0_1 = arith.constant 0 : index
    %c0_2 = arith.constant 0 : index
    %3 = vector.load %arg2[%c0, %c0_1, %c0_2] : memref<2x16x128xbf16, #tpu.memory_space<vmem>>, vector<2x16x128xbf16>
    %c0_3 = arith.constant 0 : index
    %c0_4 = arith.constant 0 : index
    %c0_5 = arith.constant 0 : index
    %4 = vector.load %arg3[%c0_3, %c0_4, %c0_5] : memref<2x16x128xbf16, #tpu.memory_space<vmem>>, vector<2x16x128xbf16>
    %5 = arith.extf %4 : vector<2x16x128xbf16> to vector<2x16x128xf32>
    %cst = arith.constant 0.000000e+00 : f32
    %6 = vector.broadcast %cst : f32 to vector<2x16x128xf32>
    %7 = arith.maximumf %5, %6 : vector<2x16x128xf32>
    %cst_6 = arith.constant dense<0.000000e+00> : vector<2x16xf32>
    %8 = vector.multi_reduction <add>, %7, %cst_6 [2] : vector<2x16x128xf32> to vector<2x16xf32>
    %cst_7 = arith.constant 1.562500e-02 : f32
    %9 = vector.broadcast %cst_7 : f32 to vector<2x16xf32>
    %10 = arith.mulf %8, %9 : vector<2x16xf32>
    %c0_8 = arith.constant 0 : index
    %c0_9 = arith.constant 0 : index
    %c0_10 = arith.constant 0 : index
    %11 = vector.load %arg4[%c0_8, %c0_9, %c0_10] : memref<2x16x128xbf16, #tpu.memory_space<vmem>>, vector<2x16x128xbf16>
    %12 = arith.extf %11 : vector<2x16x128xbf16> to vector<2x16x128xf32>
    %cst_11 = arith.constant 0.000000e+00 : f32
    %13 = vector.broadcast %cst_11 : f32 to vector<2x16x128xf32>
    %14 = arith.maximumf %12, %13 : vector<2x16x128xf32>
    %cst_12 = arith.constant dense<0.000000e+00> : vector<2x16xf32>
    %15 = vector.multi_reduction <add>, %14, %cst_12 [2] : vector<2x16x128xf32> to vector<2x16xf32>
    %cst_13 = arith.constant 1.562500e-02 : f32
    %16 = vector.broadcast %cst_13 : f32 to vector<2x16xf32>
    %17 = arith.mulf %15, %16 : vector<2x16xf32>
    %18 = vector.shape_cast %10 : vector<2x16xf32> to vector<2x1x16xf32>
    %19 = vector.shape_cast %17 : vector<2x16xf32> to vector<2x1x16xf32>
    %20 = tpu.concatenate %18, %19 in 1 : vector<2x1x16xf32>, vector<2x1x16xf32> -> vector<2x2x16xf32>
    %21 = arith.truncf %20 : vector<2x2x16xf32> to vector<2x2x16xbf16>
    "tpu.trace_start"() <{level = 10 : i32, message = "bkc,bcs->bks"}> : () -> ()
    %cst_14 = arith.constant dense<0.000000e+00> : vector<2x2x128xf32>
    %22 = tpu.matmul %21, %3, %cst_14 {dimension_numbers = #tpu.dot_dimension_numbers<[2], [1], [1], [2], [0, 0, 0, 1, 1, 2], [0], [0]>} : vector<2x2x16xbf16>, vector<2x16x128xbf16>, vector<2x2x128xf32> -> vector<2x2x128xf32>
    "tpu.trace_stop"() : () -> ()
    %c0_15 = arith.constant 0 : index
    %c0_16 = arith.constant 0 : index
    %23 = vector.load %arg7[%c0_15, %c0_16] : memref<2x128xf32, #tpu.memory_space<vmem>>, vector<2x128xf32>
    %24 = vector.extract_strided_slice %22 {offsets = [0, 0, 0], sizes = [2, 1, 128], strides = [1, 1, 1]} : vector<2x2x128xf32> to vector<2x1x128xf32>
    %25 = vector.shape_cast %24 : vector<2x1x128xf32> to vector<2x128xf32>
    %26 = arith.addf %23, %25 : vector<2x128xf32>
    %c0_17 = arith.constant 0 : index
    %c0_18 = arith.constant 0 : index
    %27 = vector.load %arg7[%c0_17, %c0_18] : memref<2x128xf32, #tpu.memory_space<vmem>>, vector<2x128xf32>
    tpu.vector_store %arg7[%c0_17, %c0_18], %26 {strides = array<i32>} : memref<2x128xf32, #tpu.memory_space<vmem>>, vector<2x128xf32>,
    %c0_19 = arith.constant 0 : index
    %c0_20 = arith.constant 0 : index
    %28 = vector.load %arg8[%c0_19, %c0_20] : memref<2x128xf32, #tpu.memory_space<vmem>>, vector<2x128xf32>
    %29 = vector.extract_strided_slice %22 {offsets = [0, 1, 0], sizes = [2, 1, 128], strides = [1, 1, 1]} : vector<2x2x128xf32> to vector<2x1x128xf32>
    %30 = vector.shape_cast %29 : vector<2x1x128xf32> to vector<2x128xf32>
    %31 = arith.addf %28, %30 : vector<2x128xf32>
    %c0_21 = arith.constant 0 : index
    %c0_22 = arith.constant 0 : index
    %32 = vector.load %arg8[%c0_21, %c0_22] : memref<2x128xf32, #tpu.memory_space<vmem>>, vector<2x128xf32>
    tpu.vector_store %arg8[%c0_21, %c0_22], %31 {strides = array<i32>} : memref<2x128xf32, #tpu.memory_space<vmem>>, vector<2x128xf32>,
    %c0_i32_23 = arith.constant 0 : i32
    %33 = arith.cmpi eq, %arg1, %c0_i32_23 : i32
    %34 = arith.extui %33 : i1 to i32
    %c0_i32_24 = arith.constant 0 : i32
    %35 = arith.cmpi ne, %34, %c0_i32_24 : i32
    scf.if %35 {
      %c0_25 = arith.constant 0 : index
      %c0_26 = arith.constant 0 : index
      %36 = vector.load %arg7[%c0_25, %c0_26] : memref<2x128xf32, #tpu.memory_space<vmem>>, vector<2x128xf32>
      %cst_27 = arith.constant 0.000000e+00 : f32
      %37 = vector.broadcast %cst_27 : f32 to vector<2x128xf32>
      %38 = arith.maximumf %36, %37 : vector<2x128xf32>
      %c0_28 = arith.constant 0 : index
      %c0_29 = arith.constant 0 : index
      %39 = vector.load %arg5[%c0_28, %c0_29] : memref<2x128xf32, #tpu.memory_space<vmem>>, vector<2x128xf32>
      tpu.vector_store %arg5[%c0_28, %c0_29], %38 {strides = array<i32>} : memref<2x128xf32, #tpu.memory_space<vmem>>, vector<2x128xf32>,
      %c0_30 = arith.constant 0 : index
      %c0_31 = arith.constant 0 : index
      %40 = vector.load %arg8[%c0_30, %c0_31] : memref<2x128xf32, #tpu.memory_space<vmem>>, vector<2x128xf32>
      %cst_32 = arith.constant 0.000000e+00 : f32
      %41 = vector.broadcast %cst_32 : f32 to vector<2x128xf32>
      %42 = arith.maximumf %40, %41 : vector<2x128xf32>
      %c0_33 = arith.constant 0 : index
      %c0_34 = arith.constant 0 : index
      %43 = vector.load %arg6[%c0_33, %c0_34] : memref<2x128xf32, #tpu.memory_space<vmem>>, vector<2x128xf32>
      tpu.vector_store %arg6[%c0_33, %c0_34], %42 {strides = array<i32>} : memref<2x128xf32, #tpu.memory_space<vmem>>, vector<2x128xf32>,
    } else {
    }
    return
  }
  func.func @transform_0(%arg0: i32, %arg1: i32) -> (i32, i32, i32) {
    %c0_i32 = arith.constant 0 : i32
    %c0_i32_0 = arith.constant 0 : i32
    return %arg0, %arg1, %c0_i32 : i32, i32, i32
  }
  func.func @transform_1(%arg0: i32, %arg1: i32) -> (i32, i32, i32) {
    %c0_i32 = arith.constant 0 : i32
    %c0_i32_0 = arith.constant 0 : i32
    return %arg0, %arg1, %c0_i32 : i32, i32, i32
  }
  func.func @transform_2(%arg0: i32, %arg1: i32) -> (i32, i32, i32) {
    %c0_i32 = arith.constant 0 : i32
    %c0_i32_0 = arith.constant 0 : i32
    return %arg0, %arg1, %c0_i32 : i32, i32, i32
  }
  func.func @transform_3(%arg0: i32, %arg1: i32) -> (i32, i32) {
    %c0_i32 = arith.constant 0 : i32
    %c0_i32_0 = arith.constant 0 : i32
    return %arg0, %c0_i32 : i32, i32
  }
  func.func @transform_4(%arg0: i32, %arg1: i32) -> (i32, i32) {
    %c0_i32 = arith.constant 0 : i32
    %c0_i32_0 = arith.constant 0 : i32
    return %arg0, %c0_i32 : i32, i32
  }
}

</mosaic_0001>

<bundles_post_ra>
// kernel: tpu_custom_call.1
= control target key start
LH: loop header
LB: loop body
LE: loop exit
PB: predicated region body
PF: predicated region fallthrough
CT: control target
= control target key end

     0   :  { %10 = vsyncpa [#allocation5], 0  ;;  %s540_s0 = inlined_call_operand.hbm [shape: bf16[2,16,128], index: 0, kind: input, shape index: {}]   ;;  %s541_s1 = inlined_call_operand.hbm [shape: bf16[2,16,128], index: 1, kind: input, shape index: {}]   ;;  %s542_s2 = inlined_call_operand.hbm [shape: bf16[2,16,128], index: 2, kind: input, shape index: {}]   ;;  %s543_s3 = inlined_call_operand.hbm [shape: f32[2,128], index: 3, kind: output, shape index: {0}]   ;;  %s544_s4 = inlined_call_operand.hbm [shape: f32[2,128], index: 4, kind: output, shape index: {1}]  }
   0x1   :  { %11 = vsyncpa [#allocation8], 0 }
   0x2   :  { %12 = vsyncpa [#allocation6], 0 }
   0x3   :  { %13 = vsyncpa [#allocation12], 0  ;;  %s485_s15 = smov [#allocation7]   ;;  %s486_s17 = smov [#allocation4]  }
   0x4   :  { %s31_s16 = sshll.u32 %s485_s15, 4  ;;  %s19_s18 = sshll.u32 %s486_s17, 4  ;;  %s32_s16 = int_to_ptr.vmem [resolvable:$true] %s31_s16  ;;  %s20_s18 = int_to_ptr.vmem [resolvable:$true] %s19_s18 }
   0x5   :  { %s385_s19 = scalar_lea.vmem %s32_s16, 256  ;;  %p390_p1 = scmp.lt.s32.totalorder %s32_s16, %s32_s16 }
   0x6   :  { %p386_p0 = scmp.ne.s32.totalorder %s32_s16, %s385_s19  ;;  %p391_p2 = scmp.lt.s32.totalorder %s385_s19, %s385_s19 }
   0x8   :  { %p392_p3 = por %p391_p2, %p390_p1 }
   0xa   :  { %p393_p4 = pnand %p392_p3, %p386_p0 }
   0xc   :  { %396 = shalt.err (!%p393_p4)
}
   0xd   :  { %s487_s20 = smov 64   ;;  %s488_s21 = smov 4  }
   0xe   :  { %37 = dma.hbm_to_vmem [thread:$0]  %s541_s1, 256, %s32_s16, [#allocation8], %s487_s20, %s487_s20, %s488_s21  }
   0xf   :  { %s405_s24 = scalar_lea.vmem %s20_s18, 256  ;;  %p410_p6 = scmp.lt.s32.totalorder %s20_s18, %s20_s18 }
  0x10   :  { %p406_p5 = scmp.ne.s32.totalorder %s20_s18, %s405_s24  ;;  %p411_p7 = scmp.lt.s32.totalorder %s405_s24, %s405_s24 }
  0x12   :  { %p412_p8 = por %p411_p7, %p410_p6 }
  0x14   :  { %p413_p9 = pnand %p412_p8, %p406_p5 }
  0x16   :  { %416 = shalt.err (!%p413_p9)
}
  0x17   :  { %25 = dma.hbm_to_vmem [thread:$0]  %s540_s0, 256, %s20_s18, [#allocation5], %s487_s20, %s487_s20, %s488_s21  }
  0x18   :  { %s489_s27 = smov [#allocation9]  }
  0x19   :  { %s43_s28 = sshll.u32 %s489_s27, 4  ;;  %s44_s28 = int_to_ptr.vmem [resolvable:$true] %s43_s28 }
  0x1a   :  { %s425_s29 = scalar_lea.vmem %s44_s28, 256  ;;  %p430_p11 = scmp.lt.s32.totalorder %s44_s28, %s44_s28 }
  0x1b   :  { %p426_p10 = scmp.ne.s32.totalorder %s44_s28, %s425_s29  ;;  %p431_p12 = scmp.lt.s32.totalorder %s425_s29, %s425_s29 }
  0x1d   :  { %p432_p13 = por %p431_p12, %p430_p11 }
  0x1f   :  { %p433_p0 = pnand %p432_p13, %p426_p10 }
  0x21   :  { %436 = shalt.err (!%p433_p0)
}
  0x22   :  { %49 = dma.hbm_to_vmem [thread:$0]  %s542_s2, 256, %s44_s28, [#allocation8], %s487_s20, %s487_s20, %s488_s21  }
  0x23   :  { %477 = dma.done.wait [#allocation5], 256  }
  0x24   :  { %478 = vsyncadd [#allocation5], 4294967040 }
  0x25   :  { %479 = dma.done.wait [#allocation8], 512  }
  0x26   :  { %480 = vsyncadd [#allocation8], 4294966784  ;;  %v348_v0 = vld [vmem:[#allocation7 + $0x8] sm:$0xff]   ;;  %v333_v1 = vld [vmem:[#allocation7] sm:$0xff]   ;;  %v490_v21 = vmov 0.0   ;;  %vm491_vm0 = vmmov 0   ;;  %v122_v23 = vlaneseq }
  0x27   :  { %v338_v2 = vunpack.c.l.bf16 %v348_v0  ;;  %v334_v3 = vunpack.c.l.bf16 %v333_v1  ;;  %v339_v4 = vunpack.c.h.bf16 %v348_v0  ;;  %v335_v5 = vunpack.c.h.bf16 %v333_v1  ;;  %v341_v6 = vld [vmem:[#allocation9] sm:$0xff]   ;;  %v349_v13 = vld [vmem:[#allocation9 + $0x8] sm:$0xff]   ;;  %354 = vmatprep.subr.bf16.mxu0 %v490_v21  ;;  %64 = vst [vmem:[#allocation2] sm:$0x3] %v490_v21  ;;  %65 = vst [vmem:[#allocation3] sm:$0x3] %v490_v21  ;;  %360 = vmatprep.subr.bf16.mxu1 %v490_v21 }
  0x28   :  { %v343_v11 = vunpack.c.h.bf16 %v341_v6  ;;  %v342_v12 = vunpack.c.l.bf16 %v341_v6  ;;  %v347_v16 = vunpack.c.h.bf16 %v349_v13  ;;  %v346_v17 = vunpack.c.l.bf16 %v349_v13  ;;  %v375_v20 = vld [vmem:[#allocation4] sm:$0xff]   ;;  %356 = vmatprep.mubr.msk.bf16.mxu0 %vm491_vm0, %v490_v21  ;;  %v376_v22 = vld [vmem:[#allocation4 + $0x8] sm:$0xff]   ;;  %362 = vmatprep.mubr.msk.bf16.mxu1 %vm491_vm0, %v490_v21  ;;  %s492_s0 = smov [#allocation11]   ;;  %s493_s5 = smov [#allocation10]  }
  0x29   :  { %v80_v7 = vmax.f32 %v338_v2, 0.0  ;;  %v78_v8 = vmax.f32 %v334_v3, 0.0  ;;  %v81_v9 = vmax.f32 %v339_v4, 0.0  ;;  %v79_v10 = vmax.f32 %v335_v5, 0.0  ;;  %355 = vmatpush3.bf16.msra.mxu0 %v375_v20  ;;  %361 = vmatpush3.bf16.msra.mxu1 %v376_v22  ;;  %s314_s2 = sshll.u32 %s492_s0, 4  ;;  %s304_s6 = sshll.u32 %s493_s5, 4  ;;  %s315_s2 = int_to_ptr.vmem [resolvable:$true] %s314_s2  ;;  %s305_s6 = int_to_ptr.vmem [resolvable:$true] %s304_s6 }
  0x2a   :  { %v103_v14 = vmax.f32 %v343_v11, 0.0  ;;  %v102_v15 = vmax.f32 %v342_v12, 0.0  ;;  %v105_v18 = vmax.f32 %v347_v16, 0.0  ;;  %v104_v19 = vmax.f32 %v346_v17, 0.0  ;;  %s437_s7 = scalar_lea.vmem %s315_s2, 32  ;;  %p442_p2 = scmp.lt.s32.totalorder %s315_s2, %s315_s2 }
  0x2b   :  { %86 = vadd.xlane.f32.xlu1 %v80_v7  ;;  %82 = vadd.xlane.f32.xlu0 %v78_v8  ;;  %v123_v24 = vand.u32 127, %v122_v23  ;;  %v125_v28 = vshrl.u32 %v122_v23, 7  ;;  %vm133_vm1 = vcmask 130112   ;;  %vm170_vm2 = vcmask 1040384   ;;  %p438_p1 = scmp.ne.s32.totalorder %s315_s2, %s437_s7  ;;  %p443_p3 = scmp.lt.s32.totalorder %s437_s7, %s437_s7 }
  0x2c   :  { %vm181_vm3 = vcmask 130048   ;;  %vm278_vm4 = vcmask 1041409  }
  0x2d   :  { %v128_v27 = vadd.s32 4294967288, %v123_v24  ;;  %v126_v33 = vsub.s32 %v123_v24, %v125_v28  ;;  %p444_p4 = por %p443_p3, %p442_p2 }
  0x2e   :  { %v283_v0 = vld [vmem:[#allocation3] sm:$0x3]  ;;  %v274_v3 = vld [vmem:[#allocation2] sm:$0x3] }
  0x2f   :  { %88 = vadd.xlane.f32.xlu1 %v81_v9  ;;  %84 = vadd.xlane.f32.xlu0 %v79_v10  ;;  %v131_v31 = vsub.s32 %v128_v27, %v125_v28  ;;  %p445_p5 = pnand %p444_p4, %p438_p1 }
  0x33   :  { %108 = vadd.xlane.f32.xlu1 %v103_v14  ;;  %106 = vadd.xlane.f32.xlu0 %v102_v15 }
  0x37   :  { %112 = vadd.xlane.f32.xlu1 %v105_v18  ;;  %110 = vadd.xlane.f32.xlu0 %v104_v19 }
  0xb4   :  { %v87_v25 = vpop.xlane.xlu1 %86  ;;  %v83_v26 = vpop.xlane.xlu0 %82 }
  0xb5   :  { %v90_v34 = vmul.f32 0.015625, %v83_v26  ;;  %v92_v41 = vmul.f32 0.015625, %v87_v25 }
  0xb7   :  { %v127_v42 = vrot.slane %v90_v34, %v126_v33  ;;  %v138_v53 = vrot.slane %v92_v41, %v126_v33 }
  0xb8   :  { %v89_v29 = vpop.xlane.xlu1 %88  ;;  %v85_v30 = vpop.xlane.xlu0 %84 }
  0xb9   :  { %v91_v32 = vmul.f32 0.015625, %v85_v30  ;;  %v93_v35 = vmul.f32 0.015625, %v89_v29 }
  0xbb   :  { %v132_v38 = vrot.slane %v91_v32, %v131_v31  ;;  %v142_v45 = vrot.slane %v93_v35, %v131_v31 }
  0xbc   :  { %v109_v36 = vpop.xlane.xlu1 %108  ;;  %v107_v37 = vpop.xlane.xlu0 %106 }
  0xbd   :  { %v115_v39 = vmul.f32 0.015625, %v109_v36  ;;  %v114_v40 = vmul.f32 0.015625, %v107_v37  ;;  %v134_v48 = vsel %vm133_vm1, %v132_v38, %v127_v42  ;;  %v143_v57 = vsel %vm133_vm1, %v142_v45, %v138_v53 }
  0xbf   :  { %v157_v43 = vrot.slane %v115_v39, %v131_v31  ;;  %v153_v44 = vrot.slane %v114_v40, %v126_v33 }
  0xc0   :  { %v113_v46 = vpop.xlane.xlu1 %112  ;;  %v111_v47 = vpop.xlane.xlu0 %110 }
  0xc1   :  { %v158_v49 = vsel %vm133_vm1, %v157_v43, %v153_v44  ;;  %v117_v50 = vmul.f32 0.015625, %v113_v46  ;;  %v116_v51 = vmul.f32 0.015625, %v111_v47 }
  0xc2   :  { %v171_v52 = vsel %vm170_vm2, %v134_v48, %v158_v49 }
  0xc3   :  { %v166_v54 = vrot.slane %v117_v50, %v131_v31  ;;  %v162_v55 = vrot.slane %v116_v51, %v126_v33  ;;  %v173_v56 = vpack.c.bf16 %v171_v52, %v171_v52 }
  0xc5   :  { %v167_v58 = vsel %vm133_vm1, %v166_v54, %v162_v55  ;;  %357 = vmatmul.mubr.msk.bf16.vlgmr.msra.gmra.mxu0 %vm181_vm3, %v173_v56 }
  0xc6   :  { %v172_v59 = vsel %vm170_vm2, %v143_v57, %v167_v58 }
  0xc7   :  { %v174_v60 = vpack.c.bf16 %v172_v59, %v172_v59 }
  0xc9   :  { %363 = vmatmul.mubr.msk.bf16.vlgmr.msra.gmra.mxu1 %vm181_vm3, %v174_v60 }
 0x185   :  { %v219_v61 = vpop.f32.mrf.mxu0 }
 0x186   :  { %v284_v63 = vrot.slane %v219_v61, 1 }
 0x187   :  { %v358_v62 = vpop.f32.mrf.mxu0 }
 0x189   :  { %v222_v1 = vpop.f32.mrf.mxu0  ;;  %v268_v2 = vpop.f32.mrf.mxu1 }
 0x18a   :  { %v277_v4 = vrot.slane %v268_v2, 7  ;;  %v285_v5 = vsel %vm278_vm4, %v268_v2, %v284_v63 }
 0x18b   :  { %v287_v6 = vadd.f32 %v285_v5, %v283_v0  ;;  %v359_v7 = vpop.f32.mrf.mxu0  ;;  %v364_v8 = vpop.f32.mrf.mxu1 }
 0x18c   :  { %v279_v9 = vsel %vm278_vm4, %v277_v4, %v219_v61 }
 0x18d   :  { %v281_v10 = vadd.f32 %v279_v9, %v274_v3  ;;  %288 = vst [vmem:[#allocation3] sm:$0x3] %v287_v6  ;;  %v271_v11 = vpop.f32.mrf.mxu1 }
 0x18f   :  { %282 = vst [vmem:[#allocation2] sm:$0x3] %v281_v10  ;;  %v365_v12 = vpop.f32.mrf.mxu1 }
 0x194   :  { %v295_v13 = vld [vmem:[#allocation3] sm:$0x3] }
 0x195   :  { %v296_v14 = vmax.f32 %v295_v13, 0.0 }
 0x196   :  { %v292_v15 = vld [vmem:[#allocation2] sm:$0x3] }
 0x197   :  { %v293_v16 = vmax.f32 %v292_v15, 0.0  ;;  %297 = vst [vmem:[#allocation11] sm:$0x3] %v296_v14 }
 0x198   :  { %448 = shalt.err (!%p445_p5)
}
 0x199   :  { %317 = dma.vmem_to_hbm [thread:$0]  %s315_s2, 32, %s544_s4, [#allocation12]   ;;  %294 = vst [vmem:[#allocation10] sm:$0x3] %v293_v16 }
 0x19a   :  { %s457_s10 = scalar_lea.vmem %s305_s6, 32  ;;  %p462_p7 = scmp.lt.s32.totalorder %s305_s6, %s305_s6 }
 0x19b   :  { %p458_p6 = scmp.ne.s32.totalorder %s305_s6, %s457_s10  ;;  %p463_p8 = scmp.lt.s32.totalorder %s457_s10, %s457_s10 }
 0x19d   :  { %p464_p9 = por %p463_p8, %p462_p7 }
 0x19f   :  { %p465_p10 = pnand %p464_p9, %p458_p6 }
 0x1a1   :  { %468 = shalt.err (!%p465_p10)
}
 0x1a2   :  { %307 = dma.vmem_to_hbm [thread:$0]  %s305_s6, 32, %s543_s3, [#allocation6]  }
 0x1a3   :  { %481 = dma.done.wait [#allocation6], 32  }
 0x1a4   :  { %482 = vsyncadd [#allocation6], 4294967264 }
 0x1a5   :  { %483 = dma.done.wait [#allocation12], 32  }
 0x1a6   :  { %484 = vsyncadd [#allocation12], 4294967264 }
 0x1a7   :  { %324 = vsyncpa [#allocation5], 1 }
 0x1a8   :  { %325 = vsyncpa [#allocation8], 1 }
 0x1a9   :  { %326 = vsyncpa [#allocation6], 1 }
 0x1aa   :  { %327 = vsyncpa [#allocation12], 1 }

</bundles_post_ra>
